<compile_context>
chip_gen: v6e
topology: v6e:2x2x1
jax: 0.10.0
libtpu: 0.0.40
codegen_flags: <defaults>
</compile_context>

<pallas_src>
import functools

import jax
import jax.numpy as jnp
from jax.experimental import pallas as pl
from jax.experimental.pallas import tpu as pltpu

HIDDEN = 64        # matches torch nn.Linear(input_size, 64)
HIDDEN_PAD = 128   # zero-padded hidden width: one full 128-lane tile


def actor_kernel(x_ref, w1_ref, b1_ref, w2_ref, b2_ref, out_ref):
    # fc1 (bf16 MXU inputs, fp32 accumulate) + relu
    x = x_ref[...].astype(jnp.bfloat16)
    h = jnp.dot(x, w1_ref[...], preferred_element_type=jnp.float32) + b1_ref[...]
    h = jnp.maximum(h, 0.0)
    # fc2 -> (tb, out_size) logits
    logits = (jnp.dot(h.astype(jnp.bfloat16), w2_ref[...],
                      preferred_element_type=jnp.float32) + b2_ref[...])
    # numerically stable, exactly normalized softmax over the last axis
    m = jnp.max(logits, axis=-1, keepdims=True)
    e = jnp.exp(logits - m)
    denom = jnp.sum(e, axis=-1, keepdims=True)
    out_ref[...] = (e / denom).astype(out_ref.dtype)


def pad_actor_params(w1, b1, w2, b2):
    """Pad/cast params once, outside the hot path.

    w1 (in,64)->(in,128) bf16 zero pads; b1 (64,)->(1,128) zero pads;
    w2 (64,out)->(128,out) bf16 zero pads (extra rows are zero so the padded
    hidden columns contribute nothing); b2 (out,)->(1,out) fp32.
    """
    in_size, hid = w1.shape
    hid2, out_size = w2.shape
    assert hid == HIDDEN and hid2 == HIDDEN
    w1p = (jnp.zeros((in_size, HIDDEN_PAD), jnp.bfloat16)
           .at[:, :hid].set(w1.astype(jnp.bfloat16)))
    b1p = jnp.zeros((1, HIDDEN_PAD), jnp.float32).at[0, :hid].set(b1.astype(jnp.float32))
    w2p = (jnp.zeros((HIDDEN_PAD, out_size), jnp.bfloat16)
           .at[:hid, :].set(w2.astype(jnp.bfloat16)))
    b2p = b2.astype(jnp.float32).reshape(1, out_size)
    return w1p, b1p, w2p, b2p


@functools.partial(jax.jit, static_argnames=("block_b",))
def _actor_forward(state, w1p, b1p, w2p, b2p, *, block_b=1024):
    B, in_size = state.shape
    out_size = w2p.shape[1]
    x_bytes = state.dtype.itemsize

    # Tiny batches: pad rows up to one 8-row sublane tile (trivial cost, keeps
    # block_shape <= array shape).  For B >= 8 no padding copy is made.
    b_arr = B
    if B < 8:
        state = jnp.pad(state, ((0, 8 - B), (0, 0)))
        b_arr = 8

    def _round8(n):
        return ((n + 7) // 8) * 8

    # Row tile: multiple of 8, <= b_arr, <= block_b.
    tb = min(block_b, (b_arr // 8) * 8)
    # v7x: make sure there are >= 2 grid steps so "parallel" shards both TCs.
    if b_arr >= 16:
        tb = min(tb, _round8(pl.cdiv(b_arr, 2)))

    # Per-generation VMEM clamp (v7x has 64 MiB physical / 32 MiB scoped
    # default; v5e scoped default is 16 MiB).  Budget double-buffered state
    # and output blocks + hidden intermediate + resident weights.
    weight_bytes = (w1p.size * 2 + w2p.size * 2 + b1p.size * 4 + b2p.size * 4)

    def vmem_est(t):
        return (2 * t * in_size * x_bytes          # state double buffer
                + 2 * t * out_size * 4             # output double buffer
                + t * HIDDEN_PAD * 4               # hidden activation
                + 2 * weight_bytes)
    while tb > 8 and vmem_est(tb) > 24 * 1024 * 1024:
        tb = max(8, ((tb // 2) // 8) * 8)

    vmem_limit = 48 * 1024 * 1024 if vmem_est(tb) > 12 * 1024 * 1024 else None

    grid = (pl.cdiv(b_arr, tb),)

    flops = 2 * b_arr * (in_size * HIDDEN_PAD + HIDDEN_PAD * out_size)
    bytes_accessed = (b_arr * in_size * x_bytes + weight_bytes
                      + b_arr * out_size * 4)

    out = pl.pallas_call(
        actor_kernel,
        out_shape=jax.ShapeDtypeStruct((b_arr, out_size), jnp.float32),
        grid=grid,
        in_specs=[
            pl.BlockSpec((tb, in_size), lambda i: (i, 0)),            # state streams
            pl.BlockSpec((in_size, HIDDEN_PAD), lambda i: (0, 0)),    # weights resident
            pl.BlockSpec((1, HIDDEN_PAD), lambda i: (0, 0)),
            pl.BlockSpec((HIDDEN_PAD, out_size), lambda i: (0, 0)),
            pl.BlockSpec((1, out_size), lambda i: (0, 0)),
        ],
        out_specs=pl.BlockSpec((tb, out_size), lambda i: (i, 0)),
        compiler_params=pltpu.CompilerParams(
            dimension_semantics=("parallel",),
            vmem_limit_bytes=vmem_limit),
        cost_estimate=pl.CostEstimate(flops=flops,
                                      transcendentals=b_arr * out_size,
                                      bytes_accessed=bytes_accessed),
    )(state, w1p, b1p, w2p, b2p)

    return out if b_arr == B else out[:B]


def actor_forward(state, w1, b1, w2, b2, *, block_b=1024):
    """state: (B, input_size) or (input_size,) -> softmax probs (torch dim=1 / dim=0)."""
    w1p, b1p, w2p, b2p = pad_actor_params(w1, b1, w2, b2)
    squeeze = state.ndim == 1
    x = state[None, :] if squeeze else state
    if x.shape[1] >= 128:
        # Wide observations: halve the streaming HBM read; matmul is bf16 anyway.
        x = x.astype(jnp.bfloat16)
    probs = _actor_forward(x, w1p, b1p, w2p, b2p, block_b=block_b)
    return probs[0] if squeeze else probs


def init_actor_params(key, input_size, output_size):
    """Deterministic init mimicking torch Linear default (uniform +/- 1/sqrt(fan_in))."""
    k1, k2, k3, k4 = jax.random.split(key, 4)
    bound1 = 1.0 / jnp.sqrt(input_size)
    bound2 = 1.0 / jnp.sqrt(HIDDEN)
    w1 = jax.random.uniform(k1, (input_size, HIDDEN), jnp.float32, -bound1, bound1)
    b1 = jax.random.uniform(k2, (HIDDEN,), jnp.float32, -bound1, bound1)
    w2 = jax.random.uniform(k3, (HIDDEN, output_size), jnp.float32, -bound2, bound2)
    b2 = jax.random.uniform(k4, (output_size,), jnp.float32, -bound2, bound2)
    return w1, b1, w2, b2


def _ref_actor(x, w1, b1, w2, b2):
    """Pure-JAX reference with the same bf16-in / fp32-accumulate precision."""
    h = jnp.dot(x.astype(jnp.bfloat16), w1.astype(jnp.bfloat16),
                preferred_element_type=jnp.float32) + b1
    h = jnp.maximum(h, 0.0)
    lg = jnp.dot(h.astype(jnp.bfloat16), w2.astype(jnp.bfloat16),
                 preferred_element_type=jnp.float32) + b2
    return jax.nn.softmax(lg, axis=-1)


if __name__ == "__main__":
    key = jax.random.PRNGKey(0)
    kx, kp, kx2 = jax.random.split(key, 3)

    batch, input_size, output_size = 2, 8, 4
    state = jax.random.normal(kx, (batch, input_size), jnp.float32)
    w1, b1, w2, b2 = init_actor_params(kp, input_size, output_size)

    # small batch (B < 8 path)
    probs = jax.block_until_ready(actor_forward(state, w1, b1, w2, b2))
    ref = _ref_actor(state, w1, b1, w2, b2)
    assert probs.shape == (batch, output_size)
    assert jnp.allclose(probs, ref, atol=1e-2), "mismatch vs reference (small batch)"
    assert jnp.allclose(jnp.sum(probs, axis=1), 1.0, atol=1e-3)

    # larger batch exercising multi-step grid + masked partial tail block
    big_b = 37
    state_big = jax.random.normal(kx2, (big_b, input_size), jnp.float32)
    probs_big = jax.block_until_ready(actor_forward(state_big, w1, b1, w2, b2))
    ref_big = _ref_actor(state_big, w1, b1, w2, b2)
    assert probs_big.shape == (big_b, output_size)
    assert jnp.allclose(probs_big, ref_big, atol=1e-2), "mismatch vs reference (big batch)"
    assert jnp.allclose(jnp.sum(probs_big, axis=1), 1.0, atol=1e-3)

    # 1-D state path (torch softmax dim=0)
    p1 = jax.block_until_ready(actor_forward(state[0], w1, b1, w2, b2))
    assert p1.shape == (output_size,)
    assert jnp.allclose(p1, ref[0], atol=1e-2)

    print("KERNEL_OK")
</pallas_src>

<mosaic_0001>
module attributes {stable_mosaic.version = 11 : i64} {
  func.func @actor_kernel(%arg0: i32, %arg1: memref<8x8xf32, #tpu.memory_space<vmem>>, %arg2: memref<8x128xbf16, #tpu.memory_space<vmem>>, %arg3: memref<1x128xf32, #tpu.memory_space<vmem>>, %arg4: memref<128x4xbf16, #tpu.memory_space<vmem>>, %arg5: memref<1x4xf32, #tpu.memory_space<vmem>>, %arg6: memref<8x4xf32, #tpu.memory_space<vmem>>) attributes {dimension_semantics = [#tpu.dimension_semantics<parallel>], iteration_bounds = array<i64: 1>, scalar_prefetch = 0 : i64, scratch_operands = 0 : i64, tpu.core_type = #tpu.core_type<tc>, window_params = [{transform_indices = @transform_0, window_bounds = array<i64: 8, 8>}, {pipeline_mode = #tpu.pipeline_mode<synchronous>, transform_indices = @transform_1, window_bounds = array<i64: 8, 128>}, {pipeline_mode = #tpu.pipeline_mode<synchronous>, transform_indices = @transform_2, window_bounds = array<i64: 1, 128>}, {pipeline_mode = #tpu.pipeline_mode<synchronous>, transform_indices = @transform_3, window_bounds = array<i64: 128, 4>}, {pipeline_mode = #tpu.pipeline_mode<synchronous>, transform_indices = @transform_4, window_bounds = array<i64: 1, 4>}, {transform_indices = @transform_5, window_bounds = array<i64: 8, 4>}]} {
    %c0 = arith.constant 0 : index
    %c0_0 = arith.constant 0 : index
    %0 = vector.load %arg1[%c0, %c0_0] : memref<8x8xf32, #tpu.memory_space<vmem>>, vector<8x8xf32>
    %1 = arith.truncf %0 : vector<8x8xf32> to vector<8x8xbf16>
    %c0_1 = arith.constant 0 : index
    %c0_2 = arith.constant 0 : index
    %2 = vector.load %arg2[%c0_1, %c0_2] : memref<8x128xbf16, #tpu.memory_space<vmem>>, vector<8x128xbf16>
    %cst = arith.constant dense<0.000000e+00> : vector<8x128xf32>
    %3 = tpu.matmul %1, %2, %cst {dimension_numbers = #tpu.dot_dimension_numbers<[1], [0], [0], [1], [0, 0, 1, 1], [], []>} : vector<8x8xbf16>, vector<8x128xbf16>, vector<8x128xf32> -> vector<8x128xf32>
    %c0_3 = arith.constant 0 : index
    %c0_4 = arith.constant 0 : index
    %4 = vector.load %arg3[%c0_3, %c0_4] : memref<1x128xf32, #tpu.memory_space<vmem>>, vector<1x128xf32>
    %5 = vector.broadcast %4 : vector<1x128xf32> to vector<8x128xf32>
    %6 = arith.addf %3, %5 : vector<8x128xf32>
    %cst_5 = arith.constant 0.000000e+00 : f32
    %7 = vector.broadcast %cst_5 : f32 to vector<8x128xf32>
    %8 = arith.maximumf %6, %7 : vector<8x128xf32>
    %9 = arith.truncf %8 : vector<8x128xf32> to vector<8x128xbf16>
    %c0_6 = arith.constant 0 : index
    %c0_7 = arith.constant 0 : index
    %10 = vector.load %arg4[%c0_6, %c0_7] : memref<128x4xbf16, #tpu.memory_space<vmem>>, vector<128x4xbf16>
    %cst_8 = arith.constant dense<0.000000e+00> : vector<8x4xf32>
    %11 = tpu.matmul %9, %10, %cst_8 {dimension_numbers = #tpu.dot_dimension_numbers<[1], [0], [0], [1], [0, 0, 1, 1], [], []>} : vector<8x128xbf16>, vector<128x4xbf16>, vector<8x4xf32> -> vector<8x4xf32>
    %c0_9 = arith.constant 0 : index
    %c0_10 = arith.constant 0 : index
    %12 = vector.load %arg5[%c0_9, %c0_10] : memref<1x4xf32, #tpu.memory_space<vmem>>, vector<1x4xf32>
    %13 = vector.broadcast %12 : vector<1x4xf32> to vector<8x4xf32>
    %14 = arith.addf %11, %13 : vector<8x4xf32>
    %cst_11 = arith.constant dense<0xFF800000> : vector<8xf32>
    %15 = vector.multi_reduction <maximumf>, %14, %cst_11 [1] : vector<8x4xf32> to vector<8xf32>
    %16 = vector.shape_cast %15 : vector<8xf32> to vector<8x1xf32>
    %17 = vector.broadcast %16 : vector<8x1xf32> to vector<8x4xf32>
    %18 = arith.subf %14, %17 : vector<8x4xf32>
    %19 = math.exp %18 : vector<8x4xf32>
    %cst_12 = arith.constant dense<0.000000e+00> : vector<8xf32>
    %20 = vector.multi_reduction <add>, %19, %cst_12 [1] : vector<8x4xf32> to vector<8xf32>
    %21 = vector.shape_cast %20 : vector<8xf32> to vector<8x1xf32>
    %22 = vector.broadcast %21 : vector<8x1xf32> to vector<8x4xf32>
    %23 = arith.divf %19, %22 : vector<8x4xf32>
    %c0_13 = arith.constant 0 : index
    %c0_14 = arith.constant 0 : index
    %24 = vector.load %arg6[%c0_13, %c0_14] : memref<8x4xf32, #tpu.memory_space<vmem>>, vector<8x4xf32>
    tpu.vector_store %arg6[%c0_13, %c0_14], %23 {strides = array<i32>} : memref<8x4xf32, #tpu.memory_space<vmem>>, vector<8x4xf32>,
    return
  }
  func.func @transform_0(%arg0: i32) -> (i32, i32) {
    %c0_i32 = arith.constant 0 : i32
    %c0_i32_0 = arith.constant 0 : i32
    return %arg0, %c0_i32 : i32, i32
  }
  func.func @transform_1(%arg0: i32) -> (i32, i32) {
    %c0_i32 = arith.constant 0 : i32
    %c0_i32_0 = arith.constant 0 : i32
    %c0_i32_1 = arith.constant 0 : i32
    return %c0_i32, %c0_i32_0 : i32, i32
  }
  func.func @transform_2(%arg0: i32) -> (i32, i32) {
    %c0_i32 = arith.constant 0 : i32
    %c0_i32_0 = arith.constant 0 : i32
    %c0_i32_1 = arith.constant 0 : i32
    return %c0_i32, %c0_i32_0 : i32, i32
  }
  func.func @transform_3(%arg0: i32) -> (i32, i32) {
    %c0_i32 = arith.constant 0 : i32
    %c0_i32_0 = arith.constant 0 : i32
    %c0_i32_1 = arith.constant 0 : i32
    return %c0_i32, %c0_i32_0 : i32, i32
  }
  func.func @transform_4(%arg0: i32) -> (i32, i32) {
    %c0_i32 = arith.constant 0 : i32
    %c0_i32_0 = arith.constant 0 : i32
    %c0_i32_1 = arith.constant 0 : i32
    return %c0_i32, %c0_i32_0 : i32, i32
  }
  func.func @transform_5(%arg0: i32) -> (i32, i32) {
    %c0_i32 = arith.constant 0 : i32
    %c0_i32_0 = arith.constant 0 : i32
    return %arg0, %c0_i32 : i32, i32
  }
}

</mosaic_0001>

<bundles_post_ra>
// kernel: _actor_forward.1
= control target key start
LH: loop header
LB: loop body
LE: loop exit
PB: predicated region body
PF: predicated region fallthrough
CT: control target
= control target key end

     0   :  { %vm35_vm0 = vcmask 1043456   ;;  %v271_v0 = vmov 0.0   ;;  %vm272_vm1 = vmmov 0   ;;  %vm31_vm2 = vcmask 64512   ;;  %s345_s1 = inlined_call_operand.vmem [shape: bf16[8,128], index: 1, kind: input, shape index: {}]   ;;  %s346_s0 = inlined_call_operand.vmem [shape: f32[8,8], index: 0, kind: input, shape index: {}]   ;;  %s347_s3 = inlined_call_operand.vmem [shape: bf16[128,4], index: 3, kind: input, shape index: {}]   ;;  %s348_s2 = inlined_call_operand.vmem [shape: f32[1,128], index: 2, kind: input, shape index: {}]   ;;  %s349_s4 = inlined_call_operand.vmem [shape: f32[1,4], index: 4, kind: input, shape index: {}]   ;;  %s350_s5 = inlined_call_operand.vmem [shape: f32[8,4], index: 5, kind: output, shape index: {}]  }
   0x1   :  { %231 = vmatprep.subr.bf16.mxu0 %v271_v0  ;;  %v23_v1 = vld [vmem:[%s345_s1] sm:$0xf]  ;;  %233 = vmatprep.mubr.msk.bf16.mxu0 %vm272_vm1, %v271_v0  ;;  %v259_v5 = vld [vmem:[%s347_s3 + $0x38] sm:$0xff]   ;;  %v260_v6 = vld [vmem:[%s347_s3 + $0x30] sm:$0xff]   ;;  %vm192_vm3 = vcmask 31744  }
   0x2   :  { %v21_v2 = vld [vmem:[%s346_s0] sm:$0xff]  ;;  %v37_v3 = vsel %vm35_vm0, %v23_v1, 0  ;;  %237 = vmatprep.subr.bf16.mxu1 %v271_v0  ;;  %253 = vmatprep.mubr.msk.bf16.mxu1 %vm272_vm1, %v271_v0  ;;  %v261_v7 = vld [vmem:[%s347_s3 + $0x28] sm:$0xff]   ;;  %v263_v9 = vld [vmem:[%s347_s3 + $0x18] sm:$0xff]  }
   0x3   :  { %v22_v4 = vpack.c.bf16 %v21_v2, %v21_v2  ;;  %232 = vmatpush3.bf16.msra.mxu0 %v37_v3  ;;  %238 = vmatpush3.bf16.msra.mxu1 %v259_v5  ;;  %v262_v8 = vld [vmem:[%s347_s3 + $0x20] sm:$0xff]   ;;  %v264_v10 = vld [vmem:[%s347_s3 + $0x10] sm:$0xff]   ;;  %v265_v11 = vld [vmem:[%s347_s3 + $0x8] sm:$0xff]  }
   0x4   :  { %239 = vmatprep.subr.bf16.mxu1 %v271_v0  ;;  %v266_v12 = vld [vmem:[%s347_s3] sm:$0xff]  }
   0x5   :  { %v209_v13 = vld [vmem:[%s348_s2] ss:$0 sm:$0xff] }
   0x6   :  { %234 = vmatmul.mubr.msk.bf16.vlgmr.msra.gmra.mxu0 %vm31_vm2, %v22_v4  ;;  %v211_v21 = vld [vmem:[%s349_s4] ss:$0 sm:$0xff] }
   0x7   :  { %240 = vmatpush3.bf16.msra.mxu1 %v260_v6 }
   0x8   :  { %241 = vmatprep.subr.bf16.mxu1 %v271_v0 }
   0xb   :  { %242 = vmatpush3.bf16.msra.mxu1 %v261_v7 }
   0xc   :  { %243 = vmatprep.subr.bf16.mxu1 %v271_v0 }
   0xf   :  { %244 = vmatpush3.bf16.msra.mxu1 %v262_v8 }
  0x10   :  { %245 = vmatprep.subr.bf16.mxu1 %v271_v0 }
  0x13   :  { %246 = vmatpush3.bf16.msra.mxu1 %v263_v9 }
  0x14   :  { %247 = vmatprep.subr.bf16.mxu1 %v271_v0 }
  0x17   :  { %248 = vmatpush3.bf16.msra.mxu1 %v264_v10 }
  0x18   :  { %249 = vmatprep.subr.bf16.mxu1 %v271_v0 }
  0x1b   :  { %250 = vmatpush3.bf16.msra.mxu1 %v265_v11 }
  0x1c   :  { %251 = vmatprep.subr.bf16.mxu1 %v271_v0 }
  0x1f   :  { %252 = vmatpush3.bf16.msra.mxu1 %v266_v12 }
  0xc6   :  { %v73_v14 = vpop.f32.mrf.mxu0 }
  0xc7   :  { %v74_v15 = vadd.f32 %v209_v13, %v73_v14 }
  0xc8   :  { %v235_v16 = vpop.f32.mrf.mxu0 }
  0xc9   :  { %v79_v17 = vmax.f32 %v74_v15, 0.0 }
  0xca   :  { %v76_v18 = vpop.f32.mrf.mxu0 }
  0xcb   :  { %v80_v19 = vpack.c.bf16 %v79_v17, %v79_v17 }
  0xcc   :  { %v236_v20 = vpop.f32.mrf.mxu0 }
  0xcd   :  { %254 = vmatmul.mubr.bf16.vlgmr.msra.gmra.mxu1 %v80_v19 }
 0x18d   :  { %v186_v22 = vpop.f32.mrf.mxu1 }
 0x18e   :  { %v187_v23 = vadd.f32 %v211_v21, %v186_v22 }
 0x18f   :  { %v255_v24 = vpop.f32.mrf.mxu1 }
 0x190   :  { %v193_v25 = vsel %vm192_vm3, %v187_v23, -inf }
 0x191   :  { %194 = vmax.xlane.f32.xlu0 %v193_v25  ;;  %v189_v26 = vpop.f32.mrf.mxu1 }
 0x193   :  { %v256_v27 = vpop.f32.mrf.mxu1 }
 0x21a   :  { %v195_v28 = vpop.xlane.xlu0 %194 }
 0x21b   :  { %v196_v29 = vsub.f32 %v187_v23, %v195_v28 }
 0x21d   :  { %v197_v30 = vmul.f32 1.442695, %v196_v29 }
 0x21f   :  { %267 = vpow2.f32 %v197_v30 }
 0x22c   :  { %v268_v31 = vpop.eup %267 }
 0x22d   :  { %v199_v32 = vsel %vm192_vm3, %v268_v31, 0.0 }
 0x22e   :  { %200 = vadd.xlane.f32.xlu0 %v199_v32 }
 0x2b7   :  { %v201_v33 = vpop.xlane.xlu0 %200 }
 0x2b8   :  { %269 = vrcp.f32 %v201_v33 }
 0x2c5   :  { %v270_v34 = vpop.eup %269 }
 0x2c6   :  { %v203_v35 = vmul.f32 %v270_v34, %v268_v31 }
 0x2c8   :  { %204 = vst.msk [vmem:[%s350_s5] sm:$0xff] %vm192_vm3, %v203_v35 }

</bundles_post_ra>
